<compile_context>
chip_gen: v7x
topology: tpu7x:2x2x1
jax: 0.10.0
libtpu: 0.0.40
codegen_flags: <defaults>
</compile_context>

<pallas_src>
import functools

import numpy as np
import jax
import jax.numpy as jnp
from jax.experimental import pallas as pl
from jax.experimental.pallas import tpu as pltpu

_F_CAP = 4096                      # max flattened lane width (s_t * d_model), flat path
_VMEM_LIMIT = 32 * 1024 * 1024     # <= physical VMEM on v5e/v6e (128 MiB) and v7x (64 MiB)


def build_pos_encoding_table(max_seq_len: int, d_model: int) -> np.ndarray:
    """Sinusoidal table, identical to the PyTorch module's __init__ (row 0 = padding)."""
    pe = np.array(
        [[pos / np.power(10000, 2.0 * (i // 2) / d_model) for i in range(d_model)]
         for pos in range(max_seq_len + 1)]
    )
    pe[:, 0::2] = np.sin(pe[:, 0::2])
    pe[:, 1::2] = np.cos(pe[:, 1::2])
    return pe.astype(np.float32)


@functools.lru_cache(maxsize=None)
def _target_tile_bytes() -> int:
    """~4 MiB output tiles (>=85% of HBM roofline on v5e/v6e); ~8 MiB on v7x where
    HBM is ~3.2 TB/s and fixed per-grid-step overhead is a larger fraction."""
    try:
        info = pltpu.get_tpu_info()
        if info.vmem_capacity_bytes <= 96 * 1024 * 1024:    # v7x: 64 MiB per TensorCore
            return 8 * 1024 * 1024
    except Exception:
        pass
    return 4 * 1024 * 1024


@functools.lru_cache(maxsize=None)
def _spread_matrix(s_t: int, d_model: int):
    """One-hot expander spread[s, s*D + d] = 1, bf16 for a single-pass MXU matmul."""
    m = np.kron(np.eye(s_t, dtype=np.float32), np.ones((1, d_model), np.float32))
    return jnp.asarray(m, dtype=jnp.bfloat16)


# ----------------------------- kernels ------------------------------------- #

def _pos_enc_flat_kernel(ids_ref, pemp_ref, pad_ref, spread_ref, out_ref):
    # Lane-dense path for d_model < 128: output viewed as [B, S*D].
    # ids_ref   : [1, B_t, S_t] int32   token ids of this (seq-tile, batch-tile)
    # pemp_ref  : [1, 1, S_t*D] f32     (table rows (s+1) - padding row), flattened
    # pad_ref   : [1, S_t*D]    f32     padding row tiled along the seq tile (resident)
    # spread_ref: [S_t, S_t*D]  bf16    one-hot expander: spread[s, s*D + d] = 1 (resident)
    # out_ref   : [B_t, S_t*D]  f32
    keep = (ids_ref[0] != 0).astype(jnp.bfloat16)                    # [B_t, S_t]
    # Spread the per-token keep flag across its d_model lanes on the idle MXU:
    # keep_e[b, s*D + d] = keep[b, s]  (exactly 0.0 or 1.0).
    keep_e = jnp.dot(keep, spread_ref[...], preferred_element_type=jnp.float32)
    # keep==1 -> pad + (pe - pad) = pe ; keep==0 -> pad.  No compare/select needed.
    out_ref[...] = pad_ref[...] + keep_e * pemp_ref[0]


def _pos_enc_3d_kernel(ids_ref, pe_ref, pad_ref, out_ref):
    # Natural [B, S, D] blocks: used when d_model >= 128 (already lane-dense)
    # or as a general fallback for awkward sequence lengths.
    # ids_ref: [B_t, S_t, 1] int32   (sequence on sublanes -> lane broadcast is free)
    # pe_ref : [S_t, D]      f32     table rows (s+1) for this sequence tile
    # pad_ref: [1, D]        f32     padding row (resident across the whole grid)
    # out_ref: [B_t, S_t, D] f32
    keep = ids_ref[...] != 0                                         # [B_t, S_t, 1]
    out_ref[...] = jnp.where(keep, pe_ref[...][None], pad_ref[...][None])


# ------------------------- tiling / path selection -------------------------- #

def _pick_flat_seq_tile(seq_len, d_model):
    """Largest sequence tile for the lane-dense flattened path, or None."""
    if d_model >= 128:
        return None                      # natural [B, S, D] blocks already lane-dense
    best = None
    s_cap = min(seq_len, _F_CAP // d_model)
    for s_t in range(8, s_cap + 1, 8):
        if seq_len % s_t == 0 and (s_t * d_model) % 128 == 0:
            best = s_t
    return best


def _pick_flat_batch_tile(batch, flat_row_bytes, n_seq_tiles):
    """Batch tile (second-minor dim of the flattened output block)."""
    if batch <= 8:
        return batch                      # block == full batch dim (always legal)
    b_t = max(8, (_target_tile_bytes() // flat_row_bytes) // 8 * 8)
    b_t = min(b_t, (batch // 8) * 8)      # multiple of 8; cdiv grid masks the ragged tail
    # Guarantee >= 2 grid steps so both of v7x's TensorCores get work.
    if n_seq_tiles == 1 and b_t >= batch and batch >= 16:
        b_t = max(8, (batch // 2) // 8 * 8)
    return b_t


def _cost(B, S, D):
    return pl.CostEstimate(
        flops=B * S * D,
        transcendentals=0,
        bytes_accessed=B * S * D * 4 + S * D * 4 + B * S * 4,
    )


# ------------------------------- wrappers ----------------------------------- #

def _forward_flat(ids, pe_table, s_t):
    """Lane-dense path for d_model < 128: output viewed as [B, S*D] so vector
    stores use all 128 lanes (d_model=32 would otherwise mask 75% of them)."""
    B, S = ids.shape
    D = pe_table.shape[1]
    F = s_t * D
    n_s = S // s_t
    b_t = _pick_flat_batch_tile(B, F * 4, n_s)
    n_b = pl.cdiv(B, b_t)

    # Cheap layout plumbing: O(B*S) ints + O(S*D) floats vs the O(B*S*D) output.
    ids_t = ids.reshape(B, n_s, s_t).transpose(1, 0, 2)              # [n_s, B, S_t]
    pad_row = pe_table[0]                                            # [D]
    pad_flat = jnp.tile(pad_row, (s_t,))[None, :]                    # [1, S_t*D]
    pe_minus_pad = (pe_table[1:1 + S].reshape(n_s, s_t, D) - pad_row).reshape(n_s, 1, F)
    spread = _spread_matrix(s_t, D)                                  # [S_t, S_t*D] bf16

    # Seq-tiles outer, batch-tiles inner: the pemp / pad / spread block indices are
    # constant across the inner loop, so those tiles stay resident in VMEM.
    grid = (n_s, n_b)
    out_flat = pl.pallas_call(
        _pos_enc_flat_kernel,
        out_shape=jax.ShapeDtypeStruct((B, S * D), jnp.float32),
        grid=grid,
        in_specs=[
            pl.BlockSpec((1, b_t, s_t), lambda j, i: (j, i, 0)),
            pl.BlockSpec((1, 1, F), lambda j, i: (j, 0, 0)),
            pl.BlockSpec((1, F), lambda j, i: (0, 0)),
            pl.BlockSpec((s_t, F), lambda j, i: (0, 0)),
        ],
        out_specs=pl.BlockSpec((b_t, F), lambda j, i: (i, j)),
        compiler_params=pltpu.CompilerParams(
            dimension_semantics=("parallel", "parallel"),
            vmem_limit_bytes=_VMEM_LIMIT),
        cost_estimate=_cost(B, S, D),
    )(ids_t, pe_minus_pad, pad_flat, spread)
    return out_flat.reshape(B, S, D)


def _forward_3d(ids, pe_table):
    """[B, S, D] blocks; used when d_model >= 128 (already lane-dense) or as a
    fallback for sequence lengths with no valid flattened tiling."""
    B, S = ids.shape
    D = pe_table.shape[1]
    row_bytes = D * 4
    target = _target_tile_bytes()

    if S % 8 == 0:
        cap = max(8, min(1024, (target // row_bytes) // 8 * 8))
        s_t = 8
        for t in range(8, min(S, cap) + 1, 8):
            if S % t == 0:
                s_t = t
    else:
        s_t = S                            # full-sequence blocks (block dim == array dim)
    b_t = max(1, min(B, target // (s_t * row_bytes)))

    n_s = S // s_t
    if n_s == 1 and b_t >= B and B >= 2:   # keep >= 2 grid steps for v7x's two cores
        b_t = pl.cdiv(B, 2)
    grid = (n_s, pl.cdiv(B, b_t))

    ids3 = ids[:, :, None]                 # sequence on sublanes inside the kernel
    pe_rows = pe_table[1:1 + S]            # rows (s+1); padding row passed separately
    pad_row = pe_table[0:1]                # [1, D], resident across the whole grid

    return pl.pallas_call(
        _pos_enc_3d_kernel,
        out_shape=jax.ShapeDtypeStruct((B, S, D), jnp.float32),
        grid=grid,
        in_specs=[
            pl.BlockSpec((b_t, s_t, 1), lambda j, i: (i, j, 0)),
            pl.BlockSpec((s_t, D), lambda j, i: (j, 0)),
            pl.BlockSpec((1, D), lambda j, i: (0, 0)),
        ],
        out_specs=pl.BlockSpec((b_t, s_t, D), lambda j, i: (i, j, 0)),
        compiler_params=pltpu.CompilerParams(
            dimension_semantics=("parallel", "parallel"),
            vmem_limit_bytes=_VMEM_LIMIT),
        cost_estimate=_cost(B, S, D),
    )(ids3, pe_rows, pad_row)


def positional_encoding_forward(inputs, pe_table):
    """inputs  : [B, S] integer token ids.
    pe_table: [max_seq_len + 1, d_model] f32 sinusoidal table with row 0 = padding
              row (exactly the PyTorch module's embedding weight).
    Returns [B, S, d_model] float32, matching the PyTorch forward."""
    B, S = inputs.shape
    Lp1, D = pe_table.shape
    if S > Lp1 - 1:
        raise ValueError("seq_len exceeds max_seq_len")
    ids = inputs.astype(jnp.int32)
    pe_table = pe_table.astype(jnp.float32)

    s_t = _pick_flat_seq_tile(S, D)
    if s_t is not None:
        return _forward_flat(ids, pe_table, s_t)
    # TODO(synk): pad the sequence axis to a multiple of 8 so small-d_model inputs
    # with awkward seq_len also take the lane-dense path instead of this fallback.
    return _forward_3d(ids, pe_table)


# --------------------------------- demo ------------------------------------- #

if __name__ == "__main__":
    key = jax.random.PRNGKey(0)
    k1, k2 = jax.random.split(key)

    def reference(inputs_np, pe_table_np):
        b, s = inputs_np.shape
        abs_enc = np.tile(np.arange(1, s + 1), (b, 1))
        abs_enc[inputs_np == 0] = 0
        return pe_table_np[abs_enc]

    # Case 1: demo-scale config (d_model=32 < 128 -> lane-dense flattened path).
    max_seq_len, d_model, batch, seq = 16, 32, 2, 8
    pe_table = build_pos_encoding_table(max_seq_len, d_model)        # [L+1, D]
    inputs = jax.random.randint(k1, (batch, seq), minval=0, maxval=5, dtype=jnp.int32)
    out = jax.block_until_ready(
        positional_encoding_forward(inputs, jnp.asarray(pe_table)))
    assert out.shape == (batch, seq, d_model) and out.dtype == jnp.float32
    np.testing.assert_allclose(
        np.asarray(out), reference(np.asarray(inputs), pe_table), rtol=0, atol=1e-6)

    # Case 2: lane-aligned config (d_model % 128 == 0 -> tiled 3-D path).
    max_seq_len2, d_model2, batch2, seq2 = 32, 128, 2, 16
    pe_table2 = build_pos_encoding_table(max_seq_len2, d_model2)
    inputs2 = jax.random.randint(k2, (batch2, seq2), minval=0, maxval=4, dtype=jnp.int32)
    out2 = jax.block_until_ready(
        positional_encoding_forward(inputs2, jnp.asarray(pe_table2)))
    np.testing.assert_allclose(
        np.asarray(out2), reference(np.asarray(inputs2), pe_table2), rtol=0, atol=1e-6)

    print("KERNEL_OK")
</pallas_src>

<mosaic_0001>
module attributes {stable_mosaic.version = 11 : i64} {
  func.func @_pos_enc_flat_kernel(%arg0: i32, %arg1: i32, %arg2: memref<1x2x8xi32, #tpu.memory_space<vmem>>, %arg3: memref<1x1x256xf32, #tpu.memory_space<vmem>>, %arg4: memref<1x256xf32, #tpu.memory_space<vmem>>, %arg5: memref<8x256xbf16, #tpu.memory_space<vmem>>, %arg6: memref<2x256xf32, #tpu.memory_space<vmem>>) attributes {dimension_semantics = [#tpu.dimension_semantics<parallel>, #tpu.dimension_semantics<parallel>], iteration_bounds = array<i64: 1, 1>, scalar_prefetch = 0 : i64, scratch_operands = 0 : i64, tpu.core_type = #tpu.core_type<tc>, window_params = [{transform_indices = @transform_0, window_bounds = array<i64: 1, 2, 8>}, {transform_indices = @transform_1, window_bounds = array<i64: 1, 1, 256>}, {pipeline_mode = #tpu.pipeline_mode<synchronous>, transform_indices = @transform_2, window_bounds = array<i64: 1, 256>}, {pipeline_mode = #tpu.pipeline_mode<synchronous>, transform_indices = @transform_3, window_bounds = array<i64: 8, 256>}, {transform_indices = @transform_4, window_bounds = array<i64: 2, 256>}]} {
    %c0 = arith.constant 0 : index
    %c0_0 = arith.constant 0 : index
    %c0_1 = arith.constant 0 : index
    %0 = vector.load %arg2[%c0, %c0_0, %c0_1] : memref<1x2x8xi32, #tpu.memory_space<vmem>>, vector<1x2x8xi32>
    %1 = vector.shape_cast %0 : vector<1x2x8xi32> to vector<2x8xi32>
    %c0_i32 = arith.constant 0 : i32
    %2 = vector.broadcast %c0_i32 : i32 to vector<2x8xi32>
    %3 = arith.cmpi ne, %1, %2 : vector<2x8xi32>
    %4 = arith.extui %3 : vector<2x8xi1> to vector<2x8xi32>
    %5 = arith.sitofp %4 : vector<2x8xi32> to vector<2x8xf32>
    %6 = arith.truncf %5 : vector<2x8xf32> to vector<2x8xbf16>
    %c0_2 = arith.constant 0 : index
    %c0_3 = arith.constant 0 : index
    %7 = vector.load %arg5[%c0_2, %c0_3] : memref<8x256xbf16, #tpu.memory_space<vmem>>, vector<8x256xbf16>
    %cst = arith.constant dense<0.000000e+00> : vector<2x256xf32>
    %8 = tpu.matmul %6, %7, %cst {dimension_numbers = #tpu.dot_dimension_numbers<[1], [0], [0], [1], [0, 0, 1, 1], [], []>} : vector<2x8xbf16>, vector<8x256xbf16>, vector<2x256xf32> -> vector<2x256xf32>
    %c0_4 = arith.constant 0 : index
    %c0_5 = arith.constant 0 : index
    %9 = vector.load %arg4[%c0_4, %c0_5] : memref<1x256xf32, #tpu.memory_space<vmem>>, vector<1x256xf32>
    %c0_6 = arith.constant 0 : index
    %c0_7 = arith.constant 0 : index
    %c0_8 = arith.constant 0 : index
    %10 = vector.load %arg3[%c0_6, %c0_7, %c0_8] : memref<1x1x256xf32, #tpu.memory_space<vmem>>, vector<1x1x256xf32>
    %11 = vector.shape_cast %10 : vector<1x1x256xf32> to vector<1x256xf32>
    %12 = vector.broadcast %11 : vector<1x256xf32> to vector<2x256xf32>
    %13 = arith.mulf %8, %12 : vector<2x256xf32>
    %14 = vector.broadcast %9 : vector<1x256xf32> to vector<2x256xf32>
    %15 = arith.addf %14, %13 : vector<2x256xf32>
    %c0_9 = arith.constant 0 : index
    %c0_10 = arith.constant 0 : index
    %16 = vector.load %arg6[%c0_9, %c0_10] : memref<2x256xf32, #tpu.memory_space<vmem>>, vector<2x256xf32>
    tpu.vector_store %arg6[%c0_9, %c0_10], %15 {strides = array<i32>} : memref<2x256xf32, #tpu.memory_space<vmem>>, vector<2x256xf32>,
    return
  }
  func.func @transform_0(%arg0: i32, %arg1: i32) -> (i32, i32, i32) {
    %c0_i32 = arith.constant 0 : i32
    %c0_i32_0 = arith.constant 0 : i32
    return %arg0, %arg1, %c0_i32 : i32, i32, i32
  }
  func.func @transform_1(%arg0: i32, %arg1: i32) -> (i32, i32, i32) {
    %c0_i32 = arith.constant 0 : i32
    %c0_i32_0 = arith.constant 0 : i32
    %c0_i32_1 = arith.constant 0 : i32
    return %arg0, %c0_i32, %c0_i32_0 : i32, i32, i32
  }
  func.func @transform_2(%arg0: i32, %arg1: i32) -> (i32, i32) {
    %c0_i32 = arith.constant 0 : i32
    %c0_i32_0 = arith.constant 0 : i32
    %c0_i32_1 = arith.constant 0 : i32
    return %c0_i32, %c0_i32_0 : i32, i32
  }
  func.func @transform_3(%arg0: i32, %arg1: i32) -> (i32, i32) {
    %c0_i32 = arith.constant 0 : i32
    %c0_i32_0 = arith.constant 0 : i32
    %c0_i32_1 = arith.constant 0 : i32
    return %c0_i32, %c0_i32_0 : i32, i32
  }
  func.func @transform_4(%arg0: i32, %arg1: i32) -> (i32, i32) {
    %c0_i32 = arith.constant 0 : i32
    return %arg1, %arg0 : i32, i32
  }
}

</mosaic_0001>

<bundles_post_ra>
// kernel: tpu_custom_call.1
= control target key start
LH: loop header
LB: loop body
LE: loop exit
PB: predicated region body
PF: predicated region fallthrough
CT: control target
= control target key end

     0   :  { %9 = vsyncpa [#allocation3], 0  ;;  %s319_s0 = inlined_call_operand.hbm [shape: s32[1,2,8], index: 0, kind: input, shape index: {}]   ;;  %s320_s1 = inlined_call_operand.vmem [shape: f32[1,1,256], index: 1, kind: input, shape index: {}]   ;;  %s321_s2 = inlined_call_operand.hbm [shape: f32[1,256], index: 2, kind: input, shape index: {}]   ;;  %s322_s3 = inlined_call_operand.vmem [shape: bf16[8,256], index: 3, kind: input, shape index: {}]   ;;  %s323_s4 = inlined_call_operand.hbm [shape: f32[2,256], index: 4, kind: output, shape index: {}]  }
   0x1   :  { %10 = vsyncpa [#allocation6], 0 }
   0x2   :  { %11 = vsyncpa [#allocation4], 0  ;;  %s247_s15 = smov [#allocation2]   ;;  %s248_s17 = smov [#allocation5]  }
   0x3   :  { %s18_s16 = sshll.u32 %s247_s15, 4  ;;  %s30_s18 = sshll.u32 %s248_s17, 4  ;;  %s19_s16 = int_to_ptr.vmem [resolvable:$true] %s18_s16  ;;  %s31_s18 = int_to_ptr.vmem [resolvable:$true] %s30_s18 }
   0x4   :  { %s175_s21 = scalar_lea.hbm %s319_s0, 32 }
   0x5   :  { %p176_p0 = scmp.ne.s32.totalorder %s319_s0, %s175_s21  ;;  %p179_p1 = scmp.lt.u32.totalorder %s175_s21, %s319_s0 }
   0x7   :  { %p181_p2 = pnand %p179_p1, %p176_p0 }
   0x9   :  { %184 = shalt.err (!%p181_p2)
}
   0xa   :  { %s185_s26 = scalar_lea.vmem %s19_s16, 32  ;;  %p190_p4 = scmp.lt.s32.totalorder %s19_s16, %s19_s16 }
   0xb   :  { %p186_p3 = scmp.ne.s32.totalorder %s19_s16, %s185_s26  ;;  %p191_p5 = scmp.lt.s32.totalorder %s185_s26, %s185_s26 }
   0xd   :  { %p192_p6 = por %p191_p5, %p190_p4 }
   0xf   :  { %p193_p7 = pnand %p192_p6, %p186_p3 }
  0x11   :  { %196 = shalt.err (!%p193_p7)
}
  0x12   :  { %21 = dma.hbm_to_vmem [thread:$0]  %s319_s0, 32, %s19_s16, [#allocation3]  }
  0x13   :  { %s197_s5 = scalar_lea.hbm %s321_s2, 32 }
  0x14   :  { %p198_p8 = scmp.ne.s32.totalorder %s321_s2, %s197_s5  ;;  %p201_p9 = scmp.lt.u32.totalorder %s197_s5, %s321_s2 }
  0x16   :  { %p203_p10 = pnand %p201_p9, %p198_p8 }
  0x18   :  { %206 = shalt.err (!%p203_p10)
}
  0x19   :  { %s207_s10 = scalar_lea.vmem %s31_s18, 32  ;;  %p212_p12 = scmp.lt.s32.totalorder %s31_s18, %s31_s18 }
  0x1a   :  { %p208_p11 = scmp.ne.s32.totalorder %s31_s18, %s207_s10  ;;  %p213_p13 = scmp.lt.s32.totalorder %s207_s10, %s207_s10 }
  0x1c   :  { %p214_p0 = por %p213_p13, %p212_p12 }
  0x1e   :  { %p215_p1 = pnand %p214_p0, %p208_p11 }
  0x20   :  { %218 = shalt.err (!%p215_p1)
}
  0x21   :  { %33 = dma.hbm_to_vmem [thread:$0]  %s321_s2, 32, %s31_s18, [#allocation6]  }
  0x22   :  { %241 = dma.done.wait [#allocation3], 32  }
  0x23   :  { %242 = vsyncadd [#allocation3], 4294967264 }
  0x24   :  { %243 = dma.done.wait [#allocation6], 32  }
  0x25   :  { %244 = vsyncadd [#allocation6], 4294967264  ;;  %v249_v0 = vmov 0   ;;  %v48_v1 = vld [vmem:[%s322_s3] sm:$0xff]  ;;  %vm58_vm0 = vcmask 1043456   ;;  %v250_v5 = vmov 0.0   ;;  %v109_v9 = vlaneseq }
  0x26   :  { %97 = vmatprep.mubr.bf16.mxu0 %v249_v0  ;;  %v43_v2 = vld [vmem:[#allocation2] sm:$0x3]  ;;  %v164_v3 = vcombine.high %v48_v1, %v48_v1  ;;  %v163_v4 = vcombine.low %v48_v1, %v48_v1  ;;  %vm54_vm2 = vcmask 64512   ;;  %v107_v12 = vld [vmem:[%s320_s1] sm:$0x3]  ;;  %s251_s3 = smov [#allocation7]  }
  0x27   :  { %vm44_vm1 = vcmp.ne.s32.totalorder %v43_v2, 0  ;;  %v110_v10 = vshrl.u32 %v109_v9, 7  ;;  %v106_v14 = vld [vmem:[#allocation5] sm:$0x3]  ;;  %s152_s15 = sshll.u32 %s251_s3, 4  ;;  %s153_s15 = int_to_ptr.vmem [resolvable:$true] %s152_s15 }
  0x28   :  { %v162_v6 = vsel %vm44_vm1, 1.0, %v250_v5  ;;  %165 = vmatprep.subr.msk.bf16.mxu0 %vm58_vm0, %v164_v3  ;;  %v60_v7 = vsel %vm58_vm0, %v163_v4, 0  ;;  %s219_s1 = scalar_lea.vmem %s153_s15, 64  ;;  %p224_p3 = scmp.lt.s32.totalorder %s153_s15, %s153_s15 }
  0x29   :  { %v47_v8 = vpack.c.bf16 %v162_v6, %v162_v6  ;;  %66 = vmatpush1.bf16.msra.mxu0 %v60_v7  ;;  %v111_v11 = vsub.s32 0, %v110_v10  ;;  %v115_v13 = vsub.s32 1, %v110_v10  ;;  %p220_p2 = scmp.ne.s32.totalorder %s153_s15, %s219_s1  ;;  %p225_p4 = scmp.lt.s32.totalorder %s219_s1, %s219_s1 }
  0x2b   :  { %v112_v15 = vrot.slane %v107_v12, %v111_v11  ;;  %v116_v16 = vrot.slane %v107_v12, %v115_v13  ;;  %v125_v17 = vrot.slane %v106_v14, %v111_v11  ;;  %v129_v19 = vrot.slane %v106_v14, %v115_v13  ;;  %p226_p5 = por %p225_p4, %p224_p3 }
  0x2c   :  { %166 = vmatmul.mubr.msk.bf16.vlgmr.msra.gmra.mrb[0].mxu0 %vm54_vm2, %v47_v8 }
  0x2d   :  { %p227_p6 = pnand %p226_p5, %p220_p2 }
  0xff   :  { %v99_v18 = vpop.f32.mrb[0].mxu0 }
 0x100   :  { %v119_v20 = vmul.f32 %v112_v15, %v99_v18  ;;  %v101_v21 = vpop.f32.mrb[1].mxu0 }
 0x101   :  { %v120_v22 = vmul.f32 %v116_v16, %v101_v21  ;;  %v103_v23 = vpop.f32.mrb[2].mxu0 }
 0x102   :  { %v132_v24 = vadd.f32 %v125_v17, %v119_v20  ;;  %v104_v25 = vpop.f32.mrb[3].mxu0 }
 0x103   :  { %v133_v26 = vadd.f32 %v129_v19, %v120_v22 }
 0x105   :  { %v136_v27 = vcombine.low %v132_v24, %v133_v26 }
 0x107   :  { %167 = vst.sshfl [vmem:[#allocation7] sm:$0x33 pattern:$0x76325410] %v136_v27 }
 0x108   :  { %230 = shalt.err (!%p227_p6)
}
 0x109   :  { %s231_s18 = scalar_lea.hbm %s323_s4, 64 }
 0x10a   :  { %p232_p7 = scmp.ne.s32.totalorder %s323_s4, %s231_s18  ;;  %p235_p8 = scmp.lt.u32.totalorder %s231_s18, %s323_s4 }
 0x10c   :  { %p237_p9 = pnand %p235_p8, %p232_p7 }
 0x10e   :  { %240 = shalt.err (!%p237_p9)
}
 0x10f   :  { %155 = dma.vmem_to_hbm [thread:$0]  %s153_s15, 64, %s323_s4, [#allocation4]  }
 0x110   :  { %245 = dma.done.wait [#allocation4], 64  }
 0x111   :  { %246 = vsyncadd [#allocation4], 4294967232 }
 0x112   :  { %159 = vsyncpa [#allocation3], 1 }
 0x113   :  { %160 = vsyncpa [#allocation6], 1 }
 0x114   :  { %161 = vsyncpa [#allocation4], 1 }

</bundles_post_ra>
